<compile_context>
chip_gen: v5e
topology: v5e:2x2
jax: 0.10.0
libtpu: 0.0.40
codegen_flags: <defaults>
</compile_context>

<pallas_src>
import functools

import jax
import jax.numpy as jnp
from jax.experimental import pallas as pl
from jax.experimental.pallas import tpu as pltpu


def _round_up(x, m):
    return ((x + m - 1) // m) * m


def _pad_rows8(t):
    n = t.shape[0]
    n8 = _round_up(n, 8)
    return jnp.pad(t, ((0, n8 - n), (0, 0))) if n8 != n else t


def _pick_edge_tile(num_edges, tile_e):
    """Edge-tile width: large (amortize ~0.35us/grid-step), multiple of 128 lanes,
    capped so the grid keeps >= 4 steps and dimension_semantics=("parallel",)
    can split work across the two TensorCores on v7x."""
    quarter = _round_up(max(-(-num_edges // 4), 128), 128)
    return max(128, min(tile_e, quarter))


# --------------- Kernel 1: per-node linear projection (x @ W + b) -----------
def _linear_kernel(x_ref, w_ref, b_ref, o_ref):
    # x: (TR, D)  w: (D, H)  b: (1, H)  o: (TR, H)
    o_ref[...] = (jnp.dot(x_ref[...], w_ref[...],
                          preferred_element_type=jnp.float32)
                  + b_ref[...]).astype(o_ref.dtype)


def linear_project(x, w, b, *, tile_rows=2048):
    """x: (N, D), w: (D, H), b: (1, H) -> (N, H) f32 (row-major for the gather)."""
    n, d = x.shape
    h = w.shape[1]
    tr = min(tile_rows, _round_up(n, 8))
    n_pad = _round_up(n, tr)
    if n_pad != n:
        x = jnp.pad(x, ((0, n_pad - n), (0, 0)))
    cost = pl.CostEstimate(
        flops=int(2 * n_pad * d * h), transcendentals=0,
        bytes_accessed=int(4 * (n_pad * d + d * h + h + n_pad * h)))
    out = pl.pallas_call(
        _linear_kernel,
        out_shape=jax.ShapeDtypeStruct((n_pad, h), jnp.float32),
        grid_spec=pltpu.PrefetchScalarGridSpec(
            num_scalar_prefetch=0,
            grid=(n_pad // tr,),
            in_specs=[
                pl.BlockSpec((tr, d), lambda i: (i, 0)),   # node-row tile
                pl.BlockSpec((d, h), lambda i: (0, 0)),    # W (resident)
                pl.BlockSpec((1, h), lambda i: (0, 0)),    # b (resident)
            ],
            out_specs=pl.BlockSpec((tr, h), lambda i: (i, 0)),
        ),
        compiler_params=pltpu.CompilerParams(
            dimension_semantics=("parallel",)),
        cost_estimate=cost,
    )(x, w, b)
    return out[:n]


# ------------- Kernel 2a: FUSED edge scorer (in-kernel row gather) ----------
def _fused_edge_kernel(sid_ref, did_ref, stab_ref, dtab_ref, o_ref, *, inv_scale):
    # sid/did: (1, TE) int32 edge ids (edges on lanes).
    # stab/dtab: (N, H) f32 projected node tables, VMEM-resident across the grid.
    sids = sid_ref[0, :]                               # (TE,) int32
    dids = did_ref[0, :]
    gs = jnp.take(stab_ref[...], sids, axis=0)         # (TE, H) in-kernel gather
    gd = jnp.take(dtab_ref[...], dids, axis=0)
    score = jnp.sum(gs * gd, axis=1)                   # (TE,) f32
    o_ref[...] = (score * inv_scale)[None, :].astype(o_ref.dtype)  # lane-dense


def _fused_vmem_bytes(ns, nd, h, te):
    tables = 2 * 4 * (ns + nd) * h        # resident tables (assume double-buffered)
    ids = 2 * 2 * 8 * te * 4              # two id streams, 2 buffers, 8-sublane pad
    outs = 2 * 8 * te * 4
    return tables + ids + outs


_FUSED_TABLE_BUDGET = 40 << 20            # stays well inside v7x's 64 MiB VMEM


def _edge_scores_fused(src_proj, dst_proj, sid, did, inv_scale, *, tile_e):
    num_edges = sid.shape[0]
    h = src_proj.shape[1]
    te = _pick_edge_tile(num_edges, tile_e)
    e_pad = _round_up(num_edges, te)
    if e_pad != num_edges:
        # Pad value 0 is a valid row: VMEM refs have no bounds check, so padded
        # lanes must still index real table rows (garbage scores sliced off).
        sid = jnp.pad(sid, (0, e_pad - num_edges))
        did = jnp.pad(did, (0, e_pad - num_edges))
    stab = _pad_rows8(src_proj)
    dtab = _pad_rows8(dst_proj)
    ns, nd = stab.shape[0], dtab.shape[0]

    kernel = functools.partial(_fused_edge_kernel, inv_scale=inv_scale)
    vmem_limit = int(min(48 << 20,
                         max(32 << 20, _fused_vmem_bytes(ns, nd, h, te) + (8 << 20))))
    cost = pl.CostEstimate(flops=int(2 * e_pad * h), transcendentals=0,
                           bytes_accessed=int(12 * e_pad + 4 * (ns + nd) * h))
    out = pl.pallas_call(
        kernel,
        out_shape=jax.ShapeDtypeStruct((1, e_pad), jnp.float32),
        grid_spec=pltpu.PrefetchScalarGridSpec(
            num_scalar_prefetch=0,
            grid=(e_pad // te,),
            in_specs=[
                pl.BlockSpec((1, te), lambda i: (0, i)),   # src ids
                pl.BlockSpec((1, te), lambda i: (0, i)),   # dst ids
                pl.BlockSpec((ns, h), lambda i: (0, 0)),   # resident src table
                pl.BlockSpec((nd, h), lambda i: (0, 0)),   # resident dst table
            ],
            out_specs=pl.BlockSpec((1, te), lambda i: (0, i)),  # lane-dense
        ),
        compiler_params=pltpu.CompilerParams(
            dimension_semantics=("parallel",),
            vmem_limit_bytes=vmem_limit),
        cost_estimate=cost,
    )(sid[None, :], did[None, :], stab, dtab)
    return out[0, :num_edges][:, None]


# --------- Kernel 2b: streaming fallback (XLA gather, bf16, lane-dense) -----
def _stream_edge_kernel(sp_ref, dp_ref, o_ref, *, inv_scale):
    # sp/dp: (H, TE) bf16 gathered projections, edges on lanes; f32 accumulate.
    prod = sp_ref[...].astype(jnp.float32) * dp_ref[...].astype(jnp.float32)
    o_ref[...] = (jnp.sum(prod, axis=0, keepdims=True) * inv_scale).astype(o_ref.dtype)


def _edge_scores_streaming(src_proj, dst_proj, sid, did, inv_scale, *, tile_e):
    num_edges = sid.shape[0]
    h = src_proj.shape[1]
    te = _pick_edge_tile(num_edges, tile_e)
    e_pad = _round_up(num_edges, te)
    # Transpose only the SMALL (N, H) tables; XLA fuses it into the gather.
    # bf16 halves the streamed (H, E) HBM traffic; kernel accumulates in f32.
    sp_t = jnp.take(src_proj.T, sid, axis=1).astype(jnp.bfloat16)   # (H, E)
    dp_t = jnp.take(dst_proj.T, did, axis=1).astype(jnp.bfloat16)
    if e_pad != num_edges:
        pad = ((0, 0), (0, e_pad - num_edges))
        sp_t = jnp.pad(sp_t, pad)
        dp_t = jnp.pad(dp_t, pad)
    kernel = functools.partial(_stream_edge_kernel, inv_scale=inv_scale)
    cost = pl.CostEstimate(flops=int(2 * e_pad * h), transcendentals=0,
                           bytes_accessed=int(2 * 2 * h * e_pad + 4 * e_pad))
    out = pl.pallas_call(
        kernel,
        out_shape=jax.ShapeDtypeStruct((1, e_pad), jnp.float32),
        grid_spec=pltpu.PrefetchScalarGridSpec(
            num_scalar_prefetch=0,
            grid=(e_pad // te,),
            in_specs=[
                pl.BlockSpec((h, te), lambda i: (0, i)),
                pl.BlockSpec((h, te), lambda i: (0, i)),
            ],
            out_specs=pl.BlockSpec((1, te), lambda i: (0, i)),  # lane-dense
        ),
        compiler_params=pltpu.CompilerParams(
            dimension_semantics=("parallel",)),
        cost_estimate=cost,
    )(sp_t, dp_t)
    return out[0, :num_edges][:, None]


# ----------------------------- Dispatcher -----------------------------------
_FUSED_GATHER_OK = None   # None = untested, True/False cached after first call.


def edge_scores(src_proj, dst_proj, src_ids, dst_ids, inv_scale,
                *, tile_e_fused=2048, tile_e_stream=8192):
    """score[e] = <src_proj[src_ids[e]], dst_proj[dst_ids[e]]> * inv_scale -> (E, 1)."""
    global _FUSED_GATHER_OK
    assert src_proj.shape[1] == dst_proj.shape[1]
    num_edges = src_ids.shape[0]
    h = src_proj.shape[1]
    # Clamp ids defensively: VMEM/in-kernel gathers have no runtime bounds check.
    sid = jnp.clip(src_ids.astype(jnp.int32), 0, src_proj.shape[0] - 1)
    did = jnp.clip(dst_ids.astype(jnp.int32), 0, dst_proj.shape[0] - 1)

    ns = _round_up(src_proj.shape[0], 8)
    nd = _round_up(dst_proj.shape[0], 8)
    te = _pick_edge_tile(num_edges, tile_e_fused)
    fits = _fused_vmem_bytes(ns, nd, h, te) <= _FUSED_TABLE_BUDGET

    if fits and _FUSED_GATHER_OK is not False:
        try:
            out = _edge_scores_fused(src_proj, dst_proj, sid, did, inv_scale,
                                     tile_e=tile_e_fused)
            if _FUSED_GATHER_OK is None:
                # One-time check (eager only): the in-kernel jnp.take gather must
                # both lower on this Mosaic version and return correct values.
                jax.block_until_ready(out)
                n = min(num_edges, 128)
                ref = jnp.sum(src_proj[sid[:n]] * dst_proj[did[:n]],
                              axis=1, keepdims=True) * inv_scale
                if not bool(jnp.allclose(out[:n], ref, atol=1e-3, rtol=1e-3)):
                    raise RuntimeError("in-kernel gather verification failed")
                _FUSED_GATHER_OK = True
            return out
        except Exception:
            # Lowering/compile failure or mismatch -> streaming fallback forever.
            _FUSED_GATHER_OK = False
    return _edge_scores_streaming(src_proj, dst_proj, sid, did, inv_scale,
                                  tile_e=tile_e_stream)


def forward(feat_src, feat_dst, src_ids, dst_ids, params, hidden_dim, num_heads):
    """score[e] = <Q(feat_src[src_ids[e]]), K(feat_dst[dst_ids[e]])> / scale."""
    # feat_drop is identity in eval mode.
    src_proj = linear_project(feat_src, params["wq"], params["bq"])   # (N_src, H)
    dst_proj = linear_project(feat_dst, params["wk"], params["bk"])   # (N_dst, H)
    inv_scale = 1.0 / (float(hidden_dim) ** 0.5 * num_heads)
    return edge_scores(src_proj, dst_proj, src_ids, dst_ids, inv_scale)


def init_params(key, query_dim, key_dim, hidden_dim, num_heads):
    h = hidden_dim * num_heads
    k1, k2, k3, k4 = jax.random.split(key, 4)
    # Weights stored already transposed to (in, out) so kernels do x @ W.
    wq = jax.random.normal(k1, (query_dim, h), jnp.float32) * 0.05
    bq = jax.random.normal(k2, (1, h), jnp.float32) * 0.05
    wk = jax.random.normal(k3, (key_dim, h), jnp.float32) * 0.05
    bk = jax.random.normal(k4, (1, h), jnp.float32) * 0.05
    return {"wq": wq, "bq": bq, "wk": wk, "bk": bk}


if __name__ == "__main__":
    query_dim, key_dim, hidden_dim, num_heads = 16, 16, 32, 1
    n_src, n_dst, n_edges = 16, 16, 256

    key = jax.random.PRNGKey(0)
    kp, ks, kd, ke1, ke2 = jax.random.split(key, 5)

    params = init_params(kp, query_dim, key_dim, hidden_dim, num_heads)
    feat_src = jax.random.normal(ks, (n_src, query_dim), jnp.float32)
    feat_dst = jax.random.normal(kd, (n_dst, key_dim), jnp.float32)
    src_ids = jax.random.randint(ke1, (n_edges,), 0, n_src)
    dst_ids = jax.random.randint(ke2, (n_edges,), 0, n_dst)

    scores = forward(feat_src, feat_dst, src_ids, dst_ids, params,
                     hidden_dim, num_heads)
    scores = jax.block_until_ready(scores)

    # Pure-JAX reference (mirrors the PyTorch module exactly, f32 end-to-end).
    sp_ref = feat_src @ params["wq"] + params["bq"]
    dp_ref = feat_dst @ params["wk"] + params["bk"]
    ref = jnp.sum(sp_ref[src_ids] * dp_ref[dst_ids], axis=1, keepdims=True) / (
        float(hidden_dim) ** 0.5 * num_heads)

    assert scores.shape == (n_edges, 1), scores.shape
    # Tolerance covers the bf16 streaming fallback (gathered tables in bf16).
    assert jnp.allclose(scores, ref, atol=5e-3, rtol=2e-2), float(
        jnp.max(jnp.abs(scores - ref)))
    print("KERNEL_OK")
</pallas_src>

<mosaic_0001>
module attributes {stable_mosaic.version = 11 : i64} {
  func.func @_linear_kernel(%arg0: i32, %arg1: memref<16x16xf32, #tpu.memory_space<vmem>>, %arg2: memref<16x32xf32, #tpu.memory_space<vmem>>, %arg3: memref<1x32xf32, #tpu.memory_space<vmem>>, %arg4: memref<16x32xf32, #tpu.memory_space<vmem>>) attributes {dimension_semantics = [#tpu.dimension_semantics<parallel>], iteration_bounds = array<i64: 1>, scalar_prefetch = 0 : i64, scratch_operands = 0 : i64, tpu.core_type = #tpu.core_type<tc>, window_params = [{transform_indices = @transform_0, window_bounds = array<i64: 16, 16>}, {pipeline_mode = #tpu.pipeline_mode<synchronous>, transform_indices = @transform_1, window_bounds = array<i64: 16, 32>}, {pipeline_mode = #tpu.pipeline_mode<synchronous>, transform_indices = @transform_2, window_bounds = array<i64: 1, 32>}, {transform_indices = @transform_3, window_bounds = array<i64: 16, 32>}]} {
    %c0 = arith.constant 0 : index
    %c0_0 = arith.constant 0 : index
    %0 = vector.load %arg1[%c0, %c0_0] : memref<16x16xf32, #tpu.memory_space<vmem>>, vector<16x16xf32>
    %c0_1 = arith.constant 0 : index
    %c0_2 = arith.constant 0 : index
    %1 = vector.load %arg2[%c0_1, %c0_2] : memref<16x32xf32, #tpu.memory_space<vmem>>, vector<16x32xf32>
    %cst = arith.constant dense<0.000000e+00> : vector<16x32xf32>
    %2 = tpu.matmul %0, %1, %cst {dimension_numbers = #tpu.dot_dimension_numbers<[1], [0], [0], [1], [0, 0, 1, 1], [], []>} : vector<16x16xf32>, vector<16x32xf32>, vector<16x32xf32> -> vector<16x32xf32>
    %c0_3 = arith.constant 0 : index
    %c0_4 = arith.constant 0 : index
    %3 = vector.load %arg3[%c0_3, %c0_4] : memref<1x32xf32, #tpu.memory_space<vmem>>, vector<1x32xf32>
    %4 = vector.broadcast %3 : vector<1x32xf32> to vector<16x32xf32>
    %5 = arith.addf %2, %4 : vector<16x32xf32>
    %c0_5 = arith.constant 0 : index
    %c0_6 = arith.constant 0 : index
    %6 = vector.load %arg4[%c0_5, %c0_6] : memref<16x32xf32, #tpu.memory_space<vmem>>, vector<16x32xf32>
    tpu.vector_store %arg4[%c0_5, %c0_6], %5 {strides = array<i32>} : memref<16x32xf32, #tpu.memory_space<vmem>>, vector<16x32xf32>,
    return
  }
  func.func @transform_0(%arg0: i32) -> (i32, i32) {
    %c0_i32 = arith.constant 0 : i32
    %c0_i32_0 = arith.constant 0 : i32
    return %arg0, %c0_i32 : i32, i32
  }
  func.func @transform_1(%arg0: i32) -> (i32, i32) {
    %c0_i32 = arith.constant 0 : i32
    %c0_i32_0 = arith.constant 0 : i32
    %c0_i32_1 = arith.constant 0 : i32
    return %c0_i32, %c0_i32_0 : i32, i32
  }
  func.func @transform_2(%arg0: i32) -> (i32, i32) {
    %c0_i32 = arith.constant 0 : i32
    %c0_i32_0 = arith.constant 0 : i32
    %c0_i32_1 = arith.constant 0 : i32
    return %c0_i32, %c0_i32_0 : i32, i32
  }
  func.func @transform_3(%arg0: i32) -> (i32, i32) {
    %c0_i32 = arith.constant 0 : i32
    %c0_i32_0 = arith.constant 0 : i32
    return %arg0, %c0_i32 : i32, i32
  }
}

</mosaic_0001>

<bundles_post_ra>
// kernel: tpu_custom_call.1
= control target key start
LH: loop header
LB: loop body
LE: loop exit
PB: predicated region body
PF: predicated region fallthrough
CT: control target
= control target key end

     0   :  { %8 = vsyncpa [#allocation3], 0  ;;  %s242_s0 = inlined_call_operand.hbm [shape: f32[16,16], index: 0, kind: input, shape index: {}]   ;;  %s243_s1 = inlined_call_operand.hbm [shape: f32[16,32], index: 1, kind: input, shape index: {}]   ;;  %s244_s2 = inlined_call_operand.vmem [shape: f32[1,32], index: 2, kind: input, shape index: {}]   ;;  %s245_s3 = inlined_call_operand.hbm [shape: f32[16,32], index: 3, kind: output, shape index: {}]  }
   0x1   :  { %9 = vsyncpa [#allocation6], 0 }
   0x2   :  { %10 = vsyncpa [#allocation4], 0  ;;  %s15_s14 = sshll.u32 %s242_s0, 4  ;;  %s196_s15 = smov [#allocation2]   ;;  %s16_s14 = int_to_ptr.hbm [resolvable:$true] %s15_s14 }
   0x3   :  { %s17_s16 = sshll.u32 %s196_s15, 4  ;;  %s28_s19 = sshll.u32 %s243_s1, 4  ;;  %s18_s16 = int_to_ptr.vmem [resolvable:$true] %s17_s16  ;;  %s29_s19 = int_to_ptr.hbm [resolvable:$true] %s28_s19 }
   0x4   :  { %s197_s20 = smov 128   ;;  %s198_s21 = smov 8  }
   0x5   :  { %23 = dma.hbm_to_vmem [thread:$0]  %s16_s14, 256, %s18_s16, [#allocation3], %s197_s20, %s197_s20, %s198_s21  }
   0x6   :  { %s199_s22 = smov [#allocation5]  }
   0x7   :  { %s30_s23 = sshll.u32 %s199_s22, 4  ;;  %s31_s23 = int_to_ptr.vmem [resolvable:$true] %s30_s23 }
   0x8   :  { %36 = dma.hbm_to_vmem [thread:$0]  %s29_s19, 256, %s31_s23, [#allocation6], %s197_s20, %s197_s20, %s198_s21  }
   0x9   :  { %190 = dma.done.wait [#allocation3], 256  }
   0xa   :  { %191 = vsyncadd [#allocation3], 4294967040 }
   0xb   :  { %192 = dma.done.wait [#allocation6], 256  }
   0xc   :  { %193 = vsyncadd [#allocation6], 4294967040  ;;  %v50_v0 = vld [vmem:[#allocation5 + $0x8] sm:$0xff]  ;;  %v49_v1 = vld [vmem:[#allocation5] sm:$0xff]  ;;  %vm55_vm0 = vcmask 130048   ;;  %s200_s24 = smov [#allocation7]  }
   0xd   :  { %76 = vmatpush.msra.mxu0 %v50_v0  ;;  %110 = vmatpush.msra.mxu1 %v50_v0  ;;  %v47_v2 = vld [vmem:[#allocation2] sm:$0xff]  ;;  %v48_v3 = vld [vmem:[#allocation2 + $0x8] sm:$0xff]  ;;  %s92_s25 = sshll.u32 %s200_s24, 4  ;;  %s94_s28 = sshll.u32 %s245_s3, 4  ;;  %vm85_vm1 = vcmask 261120   ;;  %s93_s25 = int_to_ptr.vmem [resolvable:$true] %s92_s25  ;;  %s95_s28 = int_to_ptr.hbm [resolvable:$true] %s94_s28 }
   0xe   :  { %v117_v4 = vld [vmem:[%s244_s2] ss:$0 sm:$0xff] }
   0xf   :  { %77 = vmatpush.msra.mxu0 %v49_v1  ;;  %111 = vmatpush.msra.mxu1 %v49_v1 }
  0x10   :  { %108 = vmatmul.msk.f32.vlgmr.msra.gmra.mxu0 %vm55_vm0, %v47_v2  ;;  %109 = vmatmul.msk.f32.vlgmr.msra.gmra.mxu1 %vm55_vm0, %v48_v3 }
  0x8d   :  { %v79_v5 = vpop.f32.mrf.mxu0  ;;  %v82_v6 = vpop.f32.mrf.mxu1 }
  0x8e   :  { %v80_v7 = vadd.f32 %v117_v4, %v79_v5  ;;  %v83_v8 = vadd.f32 %v117_v4, %v82_v6 }
  0x90   :  { %86 = vst.msk [vmem:[#allocation7] sm:$0xff] %vm85_vm1, %v80_v7 }
  0x91   :  { %87 = vst.msk [vmem:[#allocation7 + $0x8] sm:$0xff] %vm85_vm1, %v83_v8 }
  0x92   :  { %100 = dma.vmem_to_hbm [thread:$0]  %s93_s25, 256, %s95_s28, [#allocation4], %s197_s20, %s197_s20, %s198_s21  }
  0x93   :  { %194 = dma.done.wait [#allocation4], 256  }
  0x94   :  { %195 = vsyncadd [#allocation4], 4294967040 }
  0x95   :  { %105 = vsyncpa [#allocation3], 1 }
  0x96   :  { %106 = vsyncpa [#allocation6], 1 }
  0x97   :  { %107 = vsyncpa [#allocation4], 1 }

</bundles_post_ra>
